<compile_context>
chip_gen: v5e
topology: v5e:2x2
jax: 0.10.0
libtpu: 0.0.40
codegen_flags: <defaults>
</compile_context>

<pallas_src>
import jax
import jax.numpy as jnp
from jax.experimental import pallas as pl
from jax.experimental.pallas import tpu as pltpu

LANE = 128      # vreg lane width
SUBLANE = 8     # f32 sublane width


def _round_up(n: int, m: int) -> int:
    return (n + m - 1) // m * m


def mlp_kernel(x_ref, w1_ref, b1_ref, w2_ref, b2_ref, w3_ref, b3_ref, o_ref):
    # Layer 1: (TB, 8) @ (8, 128) + (1, 128), ReLU   (f32 MXU, f32 accumulate)
    h1 = jnp.dot(x_ref[...], w1_ref[...], preferred_element_type=jnp.float32)
    h1 = jnp.maximum(h1 + b1_ref[...], 0.0)
    # Layer 2: (TB, 128) @ (128, 64) + (1, 64), ReLU
    h2 = jnp.dot(h1, w2_ref[...], preferred_element_type=jnp.float32)
    h2 = jnp.maximum(h2 + b2_ref[...], 0.0)
    # Output layer: (TB, 64) @ (64, 128) + (1, 128)   (no activation; lane-dense store)
    out = jnp.dot(h2, w3_ref[...], preferred_element_type=jnp.float32)
    o_ref[...] = (out + b3_ref[...]).astype(o_ref.dtype)


def iris_classifier_forward(x, params, *, block_batch=512):
    """x: (B, input_dim) float32. params: w1,b1,w2,b2,w3,b3 with weights as (in, out)."""
    w1, b1 = params["w1"], params["b1"]
    w2, b2 = params["w2"], params["b2"]
    w3, b3 = params["w3"], params["b3"]
    B, in_dim = x.shape
    h1_dim, h2_dim = w1.shape[1], w2.shape[1]       # 128, 64
    out_dim = w3.shape[1]                           # 3

    # ---- lane/sublane-friendly padding (done in the wrapper, sliced off after) ----
    k1 = _round_up(in_dim, SUBLANE)                 # 4  -> 8
    n3 = _round_up(out_dim, LANE)                   # 3  -> 128 (lane-dense output slab)

    x_p  = jnp.pad(x,  ((0, 0), (0, k1 - in_dim)))
    w1_p = jnp.pad(w1, ((0, k1 - in_dim), (0, 0)))  # zero K rows contribute nothing
    w3_p = jnp.pad(w3, ((0, 0), (0, n3 - out_dim)))
    b3_p = jnp.pad(b3, ((0, 0), (0, n3 - out_dim)))

    # ---- batch tiling: TB multiple of 8, capped so tiles are v7x-VMEM friendly ----
    tb = min(block_batch, _round_up(B, SUBLANE))
    tb = _round_up(tb, SUBLANE)
    b_pad = _round_up(B, tb)
    if b_pad != B:
        x_p = jnp.pad(x_p, ((0, b_pad - B), (0, 0)))

    grid = (pl.cdiv(b_pad, tb),)

    # Weights/biases: constant block index -> VMEM-resident across all batch tiles.
    resident = lambda shape: pl.BlockSpec(shape, lambda i: (0, 0))

    out_padded = pl.pallas_call(
        mlp_kernel,
        out_shape=jax.ShapeDtypeStruct((b_pad, n3), jnp.float32),
        grid=grid,
        in_specs=[
            pl.BlockSpec((tb, k1), lambda i: (i, 0)),   # x: batch-tiled
            resident((k1, h1_dim)), resident((1, h1_dim)),
            resident((h1_dim, h2_dim)), resident((1, h2_dim)),
            resident((h2_dim, n3)), resident((1, n3)),
        ],
        out_specs=pl.BlockSpec((tb, n3), lambda i: (i, 0)),
        compiler_params=pltpu.CompilerParams(
            dimension_semantics=("parallel",)),          # shards batch tiles on v7x's 2 TCs
    )(x_p, w1_p, b1, w2, b2, w3_p, b3_p)

    return out_padded[:B, :out_dim]


def init_params(key, input_dim, output_dim):
    """Deterministic init mimicking nn.Linear default (uniform(-1/sqrt(fan_in), +1/sqrt(fan_in)))."""
    dims = [(input_dim, 128), (128, 64), (64, output_dim)]
    params = {}
    for idx, (fan_in, fan_out) in enumerate(dims, start=1):
        key, kw, kb = jax.random.split(key, 3)
        bound = 1.0 / jnp.sqrt(jnp.float32(fan_in))
        # weight stored as (in, out) == PyTorch weight.T
        params[f"w{idx}"] = jax.random.uniform(
            kw, (fan_in, fan_out), jnp.float32, minval=-bound, maxval=bound)
        params[f"b{idx}"] = jax.random.uniform(
            kb, (1, fan_out), jnp.float32, minval=-bound, maxval=bound)
    return params


def reference_forward(x, params):
    h1 = jnp.maximum(x @ params["w1"] + params["b1"], 0.0)
    h2 = jnp.maximum(h1 @ params["w2"] + params["b2"], 0.0)
    return h2 @ params["w3"] + params["b3"]


if __name__ == "__main__":
    input_dim, output_dim, batch = 4, 3, 8  # Iris: 4 features, 3 classes
    key = jax.random.PRNGKey(0)
    key, kx = jax.random.split(key)
    x = jax.random.normal(kx, (batch, input_dim), jnp.float32)
    params = init_params(key, input_dim, output_dim)

    out = iris_classifier_forward(x, params)
    out = jax.block_until_ready(out)

    ref = reference_forward(x, params)
    assert out.shape == (batch, output_dim), out.shape
    assert jnp.allclose(out, ref, atol=1e-4, rtol=1e-4), "mismatch vs reference"
    print("KERNEL_OK")
</pallas_src>

<mosaic_0001>
module attributes {stable_mosaic.version = 11 : i64} {
  func.func @mlp_kernel(%arg0: i32, %arg1: memref<8x8xf32, #tpu.memory_space<vmem>>, %arg2: memref<8x128xf32, #tpu.memory_space<vmem>>, %arg3: memref<1x128xf32, #tpu.memory_space<vmem>>, %arg4: memref<128x64xf32, #tpu.memory_space<vmem>>, %arg5: memref<1x64xf32, #tpu.memory_space<vmem>>, %arg6: memref<64x128xf32, #tpu.memory_space<vmem>>, %arg7: memref<1x128xf32, #tpu.memory_space<vmem>>, %arg8: memref<8x128xf32, #tpu.memory_space<vmem>>) attributes {dimension_semantics = [#tpu.dimension_semantics<parallel>], iteration_bounds = array<i64: 1>, scalar_prefetch = 0 : i64, scratch_operands = 0 : i64, tpu.core_type = #tpu.core_type<tc>, window_params = [{transform_indices = @transform_0, window_bounds = array<i64: 8, 8>}, {pipeline_mode = #tpu.pipeline_mode<synchronous>, transform_indices = @transform_1, window_bounds = array<i64: 8, 128>}, {pipeline_mode = #tpu.pipeline_mode<synchronous>, transform_indices = @transform_2, window_bounds = array<i64: 1, 128>}, {pipeline_mode = #tpu.pipeline_mode<synchronous>, transform_indices = @transform_3, window_bounds = array<i64: 128, 64>}, {pipeline_mode = #tpu.pipeline_mode<synchronous>, transform_indices = @transform_4, window_bounds = array<i64: 1, 64>}, {pipeline_mode = #tpu.pipeline_mode<synchronous>, transform_indices = @transform_5, window_bounds = array<i64: 64, 128>}, {pipeline_mode = #tpu.pipeline_mode<synchronous>, transform_indices = @transform_6, window_bounds = array<i64: 1, 128>}, {transform_indices = @transform_7, window_bounds = array<i64: 8, 128>}]} {
    %c0 = arith.constant 0 : index
    %c0_0 = arith.constant 0 : index
    %0 = vector.load %arg1[%c0, %c0_0] : memref<8x8xf32, #tpu.memory_space<vmem>>, vector<8x8xf32>
    %c0_1 = arith.constant 0 : index
    %c0_2 = arith.constant 0 : index
    %1 = vector.load %arg2[%c0_1, %c0_2] : memref<8x128xf32, #tpu.memory_space<vmem>>, vector<8x128xf32>
    %cst = arith.constant dense<0.000000e+00> : vector<8x128xf32>
    %2 = tpu.matmul %0, %1, %cst {dimension_numbers = #tpu.dot_dimension_numbers<[1], [0], [0], [1], [0, 0, 1, 1], [], []>} : vector<8x8xf32>, vector<8x128xf32>, vector<8x128xf32> -> vector<8x128xf32>
    %c0_3 = arith.constant 0 : index
    %c0_4 = arith.constant 0 : index
    %3 = vector.load %arg3[%c0_3, %c0_4] : memref<1x128xf32, #tpu.memory_space<vmem>>, vector<1x128xf32>
    %4 = vector.broadcast %3 : vector<1x128xf32> to vector<8x128xf32>
    %5 = arith.addf %2, %4 : vector<8x128xf32>
    %cst_5 = arith.constant 0.000000e+00 : f32
    %6 = vector.broadcast %cst_5 : f32 to vector<8x128xf32>
    %7 = arith.maximumf %5, %6 : vector<8x128xf32>
    %c0_6 = arith.constant 0 : index
    %c0_7 = arith.constant 0 : index
    %8 = vector.load %arg4[%c0_6, %c0_7] : memref<128x64xf32, #tpu.memory_space<vmem>>, vector<128x64xf32>
    %cst_8 = arith.constant dense<0.000000e+00> : vector<8x64xf32>
    %9 = tpu.matmul %7, %8, %cst_8 {dimension_numbers = #tpu.dot_dimension_numbers<[1], [0], [0], [1], [0, 0, 1, 1], [], []>} : vector<8x128xf32>, vector<128x64xf32>, vector<8x64xf32> -> vector<8x64xf32>
    %c0_9 = arith.constant 0 : index
    %c0_10 = arith.constant 0 : index
    %10 = vector.load %arg5[%c0_9, %c0_10] : memref<1x64xf32, #tpu.memory_space<vmem>>, vector<1x64xf32>
    %11 = vector.broadcast %10 : vector<1x64xf32> to vector<8x64xf32>
    %12 = arith.addf %9, %11 : vector<8x64xf32>
    %cst_11 = arith.constant 0.000000e+00 : f32
    %13 = vector.broadcast %cst_11 : f32 to vector<8x64xf32>
    %14 = arith.maximumf %12, %13 : vector<8x64xf32>
    %c0_12 = arith.constant 0 : index
    %c0_13 = arith.constant 0 : index
    %15 = vector.load %arg6[%c0_12, %c0_13] : memref<64x128xf32, #tpu.memory_space<vmem>>, vector<64x128xf32>
    %cst_14 = arith.constant dense<0.000000e+00> : vector<8x128xf32>
    %16 = tpu.matmul %14, %15, %cst_14 {dimension_numbers = #tpu.dot_dimension_numbers<[1], [0], [0], [1], [0, 0, 1, 1], [], []>} : vector<8x64xf32>, vector<64x128xf32>, vector<8x128xf32> -> vector<8x128xf32>
    %c0_15 = arith.constant 0 : index
    %c0_16 = arith.constant 0 : index
    %17 = vector.load %arg7[%c0_15, %c0_16] : memref<1x128xf32, #tpu.memory_space<vmem>>, vector<1x128xf32>
    %18 = vector.broadcast %17 : vector<1x128xf32> to vector<8x128xf32>
    %19 = arith.addf %16, %18 : vector<8x128xf32>
    %c0_17 = arith.constant 0 : index
    %c0_18 = arith.constant 0 : index
    %20 = vector.load %arg8[%c0_17, %c0_18] : memref<8x128xf32, #tpu.memory_space<vmem>>, vector<8x128xf32>
    tpu.vector_store %arg8[%c0_17, %c0_18], %19 {strides = array<i32>} : memref<8x128xf32, #tpu.memory_space<vmem>>, vector<8x128xf32>,
    return
  }
  func.func @transform_0(%arg0: i32) -> (i32, i32) {
    %c0_i32 = arith.constant 0 : i32
    %c0_i32_0 = arith.constant 0 : i32
    return %arg0, %c0_i32 : i32, i32
  }
  func.func @transform_1(%arg0: i32) -> (i32, i32) {
    %c0_i32 = arith.constant 0 : i32
    %c0_i32_0 = arith.constant 0 : i32
    %c0_i32_1 = arith.constant 0 : i32
    return %c0_i32, %c0_i32_0 : i32, i32
  }
  func.func @transform_2(%arg0: i32) -> (i32, i32) {
    %c0_i32 = arith.constant 0 : i32
    %c0_i32_0 = arith.constant 0 : i32
    %c0_i32_1 = arith.constant 0 : i32
    return %c0_i32, %c0_i32_0 : i32, i32
  }
  func.func @transform_3(%arg0: i32) -> (i32, i32) {
    %c0_i32 = arith.constant 0 : i32
    %c0_i32_0 = arith.constant 0 : i32
    %c0_i32_1 = arith.constant 0 : i32
    return %c0_i32, %c0_i32_0 : i32, i32
  }
  func.func @transform_4(%arg0: i32) -> (i32, i32) {
    %c0_i32 = arith.constant 0 : i32
    %c0_i32_0 = arith.constant 0 : i32
    %c0_i32_1 = arith.constant 0 : i32
    return %c0_i32, %c0_i32_0 : i32, i32
  }
  func.func @transform_5(%arg0: i32) -> (i32, i32) {
    %c0_i32 = arith.constant 0 : i32
    %c0_i32_0 = arith.constant 0 : i32
    %c0_i32_1 = arith.constant 0 : i32
    return %c0_i32, %c0_i32_0 : i32, i32
  }
  func.func @transform_6(%arg0: i32) -> (i32, i32) {
    %c0_i32 = arith.constant 0 : i32
    %c0_i32_0 = arith.constant 0 : i32
    %c0_i32_1 = arith.constant 0 : i32
    return %c0_i32, %c0_i32_0 : i32, i32
  }
  func.func @transform_7(%arg0: i32) -> (i32, i32) {
    %c0_i32 = arith.constant 0 : i32
    %c0_i32_0 = arith.constant 0 : i32
    return %arg0, %c0_i32 : i32, i32
  }
}

</mosaic_0001>

<bundles_post_ra>
// kernel: tpu_custom_call.1
= control target key start
LH: loop header
LB: loop body
LE: loop exit
PB: predicated region body
PF: predicated region fallthrough
CT: control target
= control target key end

     0   :  { %vm33_vm0 = vcmask 64512   ;;  %s315_s0 = inlined_call_operand.vmem [shape: f32[8,8], index: 0, kind: input, shape index: {}]   ;;  %s316_s1 = inlined_call_operand.vmem [shape: f32[8,128], index: 1, kind: input, shape index: {}]   ;;  %s317_s2 = inlined_call_operand.vmem [shape: f32[1,128], index: 2, kind: input, shape index: {}]   ;;  %s318_s3 = inlined_call_operand.vmem [shape: f32[128,64], index: 3, kind: input, shape index: {}]   ;;  %s319_s4 = inlined_call_operand.vmem [shape: f32[1,64], index: 4, kind: input, shape index: {}]   ;;  %s320_s5 = inlined_call_operand.vmem [shape: f32[64,128], index: 5, kind: input, shape index: {}]   ;;  %s321_s6 = inlined_call_operand.vmem [shape: f32[1,128], index: 6, kind: input, shape index: {}]   ;;  %s322_s7 = inlined_call_operand.hbm [shape: f32[8,128], index: 7, kind: output, shape index: {}]  }
   0x1   :  { %v28_v0 = vld [vmem:[%s316_s1] sm:$0xff]  ;;  %v73_v2 = vld [vmem:[%s318_s3 + $0x78] sm:$0xff]  ;;  %v72_v3 = vld [vmem:[%s318_s3 + $0x70] sm:$0xff] }
   0x2   :  { %v27_v1 = vld [vmem:[%s315_s0] sm:$0xff]  ;;  %52 = vmatpush.msra.mxu0 %v28_v0  ;;  %78 = vmatpush.msra.mxu1 %v73_v2  ;;  %v71_v4 = vld [vmem:[%s318_s3 + $0x68] sm:$0xff]  ;;  %v69_v6 = vld [vmem:[%s318_s3 + $0x58] sm:$0xff] }
   0x3   :  { %152 = vmatmul.msk.f32.vlgmr.msra.gmra.mxu0 %vm33_vm0, %v27_v1  ;;  %v70_v5 = vld [vmem:[%s318_s3 + $0x60] sm:$0xff] }
   0x4   :  { %79 = vmatpush.msra.mxu1 %v72_v3 }
   0x6   :  { %80 = vmatpush.msra.mxu1 %v71_v4 }
   0x7   :  { %12 = vsyncpa [#allocation3], 0  ;;  %v68_v7 = vld [vmem:[%s318_s3 + $0x50] sm:$0xff]  ;;  %v67_v8 = vld [vmem:[%s318_s3 + $0x48] sm:$0xff]  ;;  %vm111_vm1 = vcmask 523264   ;;  %s184_s30 = smov [#allocation2]  }
   0x8   :  { %81 = vmatpush.msra.mxu1 %v70_v5  ;;  %v66_v9 = vld [vmem:[%s318_s3 + $0x40] sm:$0xff]  ;;  %v65_v10 = vld [vmem:[%s318_s3 + $0x38] sm:$0xff]  ;;  %v64_v11 = vld [vmem:[%s318_s3 + $0x30] sm:$0xff]  ;;  %s141_s8 = sshll.u32 %s184_s30, 4  ;;  %s142_s8 = int_to_ptr.vmem [resolvable:$true] %s141_s8 }
   0x9   :  { %v63_v12 = vld [vmem:[%s318_s3 + $0x28] sm:$0xff]  ;;  %v62_v13 = vld [vmem:[%s318_s3 + $0x20] sm:$0xff]  ;;  %v61_v14 = vld [vmem:[%s318_s3 + $0x18] sm:$0xff] }
   0xa   :  { %82 = vmatpush.msra.mxu1 %v69_v6  ;;  %v60_v15 = vld [vmem:[%s318_s3 + $0x10] sm:$0xff]  ;;  %v59_v16 = vld [vmem:[%s318_s3 + $0x8] sm:$0xff]  ;;  %v58_v17 = vld [vmem:[%s318_s3] sm:$0xff] }
   0xb   :  { %v106_v18 = vld [vmem:[%s320_s5 + $0x38] sm:$0xff]  ;;  %v105_v19 = vld [vmem:[%s320_s5 + $0x30] sm:$0xff]  ;;  %v104_v20 = vld [vmem:[%s320_s5 + $0x28] sm:$0xff] }
   0xc   :  { %83 = vmatpush.msra.mxu1 %v68_v7  ;;  %123 = vmatpush.msra.mxu2 %v106_v18  ;;  %v103_v21 = vld [vmem:[%s320_s5 + $0x20] sm:$0xff]  ;;  %v102_v22 = vld [vmem:[%s320_s5 + $0x18] sm:$0xff]  ;;  %v101_v27 = vld [vmem:[%s320_s5 + $0x10] sm:$0xff] }
   0xd   :  { %v155_v23 = vld [vmem:[%s317_s2] ss:$0 sm:$0xff]  ;;  %v100_v28 = vld [vmem:[%s320_s5 + $0x8] sm:$0xff] }
   0xe   :  { %84 = vmatpush.msra.mxu1 %v67_v8  ;;  %124 = vmatpush.msra.mxu2 %v105_v19  ;;  %v99_v29 = vld [vmem:[%s320_s5] sm:$0xff]  ;;  %s143_s5 = sshll.u32 %s322_s7, 4  ;;  %s144_s5 = int_to_ptr.hbm [resolvable:$true] %s143_s5 }
   0xf   :  { %v156_v30 = vld [vmem:[%s319_s4] ss:$0 sm:$0xff] }
  0x10   :  { %85 = vmatpush.msra.mxu1 %v66_v9  ;;  %125 = vmatpush.msra.mxu2 %v104_v20  ;;  %v157_v34 = vld [vmem:[%s321_s6] ss:$0 sm:$0xff] }
  0x12   :  { %86 = vmatpush.msra.mxu1 %v65_v10  ;;  %126 = vmatpush.msra.mxu2 %v103_v21 }
  0x14   :  { %87 = vmatpush.msra.mxu1 %v64_v11  ;;  %127 = vmatpush.msra.mxu2 %v102_v22 }
  0x16   :  { %88 = vmatpush.msra.mxu1 %v63_v12  ;;  %128 = vmatpush.msra.mxu2 %v101_v27 }
  0x18   :  { %89 = vmatpush.msra.mxu1 %v62_v13  ;;  %129 = vmatpush.msra.mxu2 %v100_v28 }
  0x1a   :  { %90 = vmatpush.msra.mxu1 %v61_v14  ;;  %130 = vmatpush.msra.mxu2 %v99_v29 }
  0x1c   :  { %91 = vmatpush.msra.mxu1 %v60_v15 }
  0x1e   :  { %92 = vmatpush.msra.mxu1 %v59_v16 }
  0x20   :  { %93 = vmatpush.msra.mxu1 %v58_v17 }
  0x80   :  { %v54_v24 = vpop.f32.mrf.mxu0 }
  0x81   :  { %v55_v25 = vadd.f32 %v155_v23, %v54_v24 }
  0x83   :  { %v57_v26 = vmax.f32 %v55_v25, 0.0 }
  0x85   :  { %94 = vmatmul.f32.vlgmr.msra.gmra.mxu1 %v57_v26 }
 0x102   :  { %v95_v31 = vpop.f32.mrf.mxu1 }
 0x103   :  { %v96_v32 = vadd.f32 %v156_v30, %v95_v31 }
 0x105   :  { %v98_v33 = vmax.f32 %v96_v32, 0.0 }
 0x107   :  { %153 = vmatmul.msk.f32.vlgmr.msra.gmra.mxu2 %vm111_vm1, %v98_v33 }
 0x18a   :  { %v132_v35 = vpop.f32.mrf.mxu2 }
 0x18b   :  { %v133_v36 = vadd.f32 %v157_v34, %v132_v35 }
 0x18d   :  { %135 = vst [vmem:[#allocation2] sm:$0xff] %v133_v36 }
 0x18e   :  { %146 = dma.vmem_to_hbm [thread:$0]  %s142_s8, 128, %s144_s5, [#allocation3]  }
 0x18f   :  { %182 = dma.done.wait [#allocation3], 128  }
 0x190   :  { %183 = vsyncadd [#allocation3], 4294967168 }
 0x191   :  { %151 = vsyncpa [#allocation3], 1 }

</bundles_post_ra>
